<compile_context>
chip_gen: v5e
topology: v5e:2x2
jax: 0.10.0
libtpu: 0.0.40
codegen_flags: <defaults>
</compile_context>

<pallas_src>
import jax
import jax.numpy as jnp
from jax.experimental import pallas as pl
from jax.experimental.pallas import tpu as pltpu


# ----------------------------- helpers ---------------------------------------

_VMEM_LIMIT_BYTES = 32 * 1024 * 1024   # explicit; within v7x scoped budget
_FAST_PATH_BYTES = 2 * 1024 * 1024     # total operand bytes for the single-block path
_TINY_WEIGHT_ELEMS = 512 * 512         # weights at/below this keep an unpadded copy


def _round_up(x: int, m: int) -> int:
    return ((x + m - 1) // m) * m


def _sublane(dtype) -> int:
    # sublane packing granularity: 8 for 4-byte, 16 for 2-byte, 32 for 1-byte dtypes
    return {4: 8, 2: 16, 1: 32}.get(jnp.dtype(dtype).itemsize, 8)


def _largest_div_128(total: int, cap: int) -> int:
    """Largest multiple of 128 that divides `total` (itself a multiple of 128), <= cap."""
    t = (min(total, max(cap, 128)) // 128) * 128
    t = max(t, 128)
    while total % t != 0:
        t -= 128
    return t


# ----------------------------- kernels ----------------------------------------

def _linear_single_block_kernel(x_ref, w_ref, b_ref, o_ref):
    # Whole problem in one VMEM block: y = x @ w + b (no padding, no grid).
    acc = jnp.dot(x_ref[...], w_ref[...], preferred_element_type=jnp.float32)
    o_ref[...] = (acc + b_ref[...].astype(jnp.float32)).astype(o_ref.dtype)


def _linear_tiled_kernel(x_ref, w_ref, b_ref, o_ref, acc_ref):
    # x_ref: (tm, tk), w_ref: (tk, tn), b_ref: (1, tn), o_ref: (tm, tn)
    k = pl.program_id(2)

    @pl.when(k == 0)
    def _():
        # Seed the accumulator with the (broadcast) bias: epilogue is just cast+store.
        acc_ref[...] = jnp.broadcast_to(
            b_ref[...].astype(jnp.float32), acc_ref.shape
        )

    acc_ref[...] += jnp.dot(
        x_ref[...], w_ref[...], preferred_element_type=jnp.float32
    )

    @pl.when(k == pl.num_programs(2) - 1)
    def _():
        o_ref[...] = acc_ref[...].astype(o_ref.dtype)


# ----------------------------- wrapper -----------------------------------------

def prepare_perceptron_params(weight, bias, compute_dtype=None):
    """One-time (per model) parameter prep: transpose nn.Linear's (OUT, IN) weight to
    (IN, OUT), pad to lane multiples for the tiled path, optionally cast to bf16.
    Call this ONCE at init; pass the result to perceptron_forward on every call."""
    OUT, IN = weight.shape
    w_t = weight.T                                      # (IN, OUT), done once
    if compute_dtype is not None:
        w_t = w_t.astype(compute_dtype)

    IN_p = _round_up(IN, 128)
    OUT_p = _round_up(OUT, 128)
    if (IN_p, OUT_p) != (IN, OUT):
        w_pad = jnp.pad(w_t, ((0, IN_p - IN), (0, OUT_p - OUT)))
    else:
        w_pad = w_t
    b_pad = jnp.pad(bias, (0, OUT_p - OUT)).reshape(1, OUT_p)

    tiny = (IN * OUT) <= _TINY_WEIGHT_ELEMS
    return {
        "IN": IN, "OUT": OUT, "IN_p": IN_p, "OUT_p": OUT_p,
        "w_pad": w_pad, "b_pad": b_pad,
        # unpadded copies only kept for tiny layers (fast path, negligible memory)
        "w_t": w_t if tiny else None,
        "bias2d": bias.reshape(1, OUT) if tiny else None,
        "tiny": tiny,
        "compute_dtype": compute_dtype,
    }


def _pick_tiles(B, OUT_p, IN_p, x_dtype):
    sub = _sublane(x_dtype)
    # M: as few <=512-row tiles as possible without over-padding B.
    n_m = -(-B // 512)
    tm = _round_up(-(-B // n_m), sub)
    B_p = n_m * tm
    # N: <=512, and keep >=2 N tiles when OUT_p >= 256 so both v7x cores get work.
    tn_cap = 512
    if OUT_p >= 256:
        tn_cap = min(tn_cap, OUT_p // 2)
    tn = _largest_div_128(OUT_p, tn_cap)
    # K: big reduction tiles cut grid steps / accumulator RMW traffic.
    tk = _largest_div_128(IN_p, 2048)
    # Small batch => weight-streaming bound => deeper buffering on the weight.
    w_buffers = 3 if tm < 128 else 2
    return tm, tn, tk, B_p, w_buffers


def perceptron_forward(x, params):
    """y = x @ weight.T + bias, using params from prepare_perceptron_params."""
    B, IN = x.shape
    assert IN == params["IN"]
    OUT = params["OUT"]
    out_dtype = x.dtype

    cdt = params["compute_dtype"]
    xk = x.astype(cdt) if cdt is not None else x

    # ---- Fast path: tiny layer + small batch -> single block, zero padding. ----
    if params["tiny"] and B <= 1024:
        isz = jnp.dtype(xk.dtype).itemsize
        total_bytes = (B * IN + IN * OUT) * isz + B * OUT * jnp.dtype(out_dtype).itemsize
        if total_bytes <= _FAST_PATH_BYTES:
            return pl.pallas_call(
                _linear_single_block_kernel,
                out_shape=jax.ShapeDtypeStruct((B, OUT), out_dtype),
            )(xk, params["w_t"], params["bias2d"])

    # ---- Tiled accumulator path. ----
    IN_p, OUT_p = params["IN_p"], params["OUT_p"]
    w_pad, b_pad = params["w_pad"], params["b_pad"]
    tm, tn, tk, B_p, w_buffers = _pick_tiles(B, OUT_p, IN_p, xk.dtype)

    # Zero-padding of x is semantically safe: padded K columns contribute 0,
    # padded rows are sliced off before returning.
    if (B_p, IN_p) != (B, IN):
        x_p = jnp.pad(xk, ((0, B_p - B), (0, IN_p - IN)))
    else:
        x_p = xk

    grid = (B_p // tm, OUT_p // tn, IN_p // tk)

    if w_buffers > 2:
        try:
            w_spec = pl.BlockSpec((tk, tn), lambda i, j, k: (k, j),
                                  pipeline_mode=pl.Buffered(w_buffers))
        except TypeError:  # older jax without pipeline_mode kwarg
            w_spec = pl.BlockSpec((tk, tn), lambda i, j, k: (k, j))
    else:
        w_spec = pl.BlockSpec((tk, tn), lambda i, j, k: (k, j))

    out = pl.pallas_call(
        _linear_tiled_kernel,
        out_shape=jax.ShapeDtypeStruct((B_p, OUT_p), out_dtype),
        grid=grid,
        in_specs=[
            pl.BlockSpec((tm, tk), lambda i, j, k: (i, k)),   # x tile
            w_spec,                                           # W^T tile
            pl.BlockSpec((1, tn), lambda i, j, k: (0, j)),    # bias, resident over k
        ],
        out_specs=pl.BlockSpec((tm, tn), lambda i, j, k: (i, j)),
        scratch_shapes=[pltpu.VMEM((tm, tn), jnp.float32)],
        compiler_params=pltpu.CompilerParams(
            dimension_semantics=("parallel", "parallel", "arbitrary"),
            vmem_limit_bytes=_VMEM_LIMIT_BYTES,
        ),
    )(x_p, w_pad, b_pad)

    return out[:B, :OUT]


# ----------------------------- demo / test -------------------------------------

if __name__ == "__main__":
    key = jax.random.PRNGKey(0)
    keys = jax.random.split(key, 9)

    # --- Case 1: the Perceptron demo shape (8 x 32 -> 16): tiny fast path -------
    batch, in_features, out_features = 8, 32, 16
    bound = 1.0 / (in_features ** 0.5)
    weight = jax.random.uniform(keys[0], (out_features, in_features), jnp.float32,
                                -bound, bound)
    bias = jax.random.uniform(keys[1], (out_features,), jnp.float32, -bound, bound)
    x = jax.random.normal(keys[2], (batch, in_features), jnp.float32)

    params = prepare_perceptron_params(weight, bias)   # hoisted: once per model
    out = jax.block_until_ready(perceptron_forward(x, params))
    ref = x @ weight.T + bias
    assert out.shape == ref.shape
    assert jnp.allclose(out, ref, atol=1e-5, rtol=1e-5)

    # --- Case 2: larger layer -> tiled accumulator path (grid over M/N/K) -------
    B2, IN2, OUT2 = 256, 1024, 384
    bound2 = 1.0 / (IN2 ** 0.5)
    w2 = jax.random.uniform(keys[3], (OUT2, IN2), jnp.float32, -bound2, bound2)
    b2 = jax.random.uniform(keys[4], (OUT2,), jnp.float32, -bound2, bound2)
    x2 = jax.random.normal(keys[5], (B2, IN2), jnp.float32)

    params2 = prepare_perceptron_params(w2, b2)
    out2 = jax.block_until_ready(perceptron_forward(x2, params2))
    ref2 = x2 @ w2.T + b2
    assert out2.shape == ref2.shape
    assert jnp.allclose(out2, ref2, atol=1e-4, rtol=1e-4)

    # --- Case 3: small batch, large weight -> weight-streaming tiled path -------
    B3, IN3, OUT3 = 8, 2048, 1024
    bound3 = 1.0 / (IN3 ** 0.5)
    w3 = jax.random.uniform(keys[6], (OUT3, IN3), jnp.float32, -bound3, bound3)
    b3 = jax.random.uniform(keys[7], (OUT3,), jnp.float32, -bound3, bound3)
    x3 = jax.random.normal(keys[8], (B3, IN3), jnp.float32)

    params3 = prepare_perceptron_params(w3, b3)
    out3 = jax.block_until_ready(perceptron_forward(x3, params3))
    ref3 = x3 @ w3.T + b3
    assert out3.shape == ref3.shape
    assert jnp.allclose(out3, ref3, atol=1e-4, rtol=1e-4)

    print("KERNEL_OK")
</pallas_src>

<mosaic_0001>
module attributes {stable_mosaic.version = 11 : i64} {
  func.func @_linear_single_block_kernel(%arg0: memref<8x32xf32, #tpu.memory_space<vmem>>, %arg1: memref<32x16xf32, #tpu.memory_space<vmem>>, %arg2: memref<1x16xf32, #tpu.memory_space<vmem>>, %arg3: memref<8x16xf32, #tpu.memory_space<vmem>>) attributes {dimension_semantics = [], scalar_prefetch = 0 : i64, scratch_operands = 0 : i64, tpu.core_type = #tpu.core_type<tc>} {
    %c0 = arith.constant 0 : index
    %c0_0 = arith.constant 0 : index
    %0 = vector.load %arg0[%c0, %c0_0] : memref<8x32xf32, #tpu.memory_space<vmem>>, vector<8x32xf32>
    %c0_1 = arith.constant 0 : index
    %c0_2 = arith.constant 0 : index
    %1 = vector.load %arg1[%c0_1, %c0_2] : memref<32x16xf32, #tpu.memory_space<vmem>>, vector<32x16xf32>
    %cst = arith.constant dense<0.000000e+00> : vector<8x16xf32>
    %2 = tpu.matmul %0, %1, %cst {dimension_numbers = #tpu.dot_dimension_numbers<[1], [0], [0], [1], [0, 0, 1, 1], [], []>} : vector<8x32xf32>, vector<32x16xf32>, vector<8x16xf32> -> vector<8x16xf32>
    %c0_3 = arith.constant 0 : index
    %c0_4 = arith.constant 0 : index
    %3 = vector.load %arg2[%c0_3, %c0_4] : memref<1x16xf32, #tpu.memory_space<vmem>>, vector<1x16xf32>
    %4 = vector.broadcast %3 : vector<1x16xf32> to vector<8x16xf32>
    %5 = arith.addf %2, %4 : vector<8x16xf32>
    %c0_5 = arith.constant 0 : index
    %c0_6 = arith.constant 0 : index
    %6 = vector.load %arg3[%c0_5, %c0_6] : memref<8x16xf32, #tpu.memory_space<vmem>>, vector<8x16xf32>
    tpu.vector_store %arg3[%c0_5, %c0_6], %5 {strides = array<i32>} : memref<8x16xf32, #tpu.memory_space<vmem>>, vector<8x16xf32>,
    return
  }
}

</mosaic_0001>

<bundles_post_ra>
// kernel: tpu_custom_call.1
= control target key start
LH: loop header
LB: loop body
LE: loop exit
PB: predicated region body
PF: predicated region fallthrough
CT: control target
= control target key end

     0   :  { %s137_s0 = inlined_call_operand.vmem [shape: f32[8,32], index: 0, kind: input, shape index: {}]   ;;  %s138_s1 = inlined_call_operand.vmem [shape: f32[32,16], index: 1, kind: input, shape index: {}]   ;;  %s139_s2 = inlined_call_operand.vmem [shape: f32[1,16], index: 2, kind: input, shape index: {}]   ;;  %s140_s3 = inlined_call_operand.hbm [shape: f32[8,16], index: 3, kind: output, shape index: {}]  }
   0x1   :  { %v19_v0 = vld [vmem:[%s138_s1 + $0x18] sm:$0xff]  ;;  %v18_v1 = vld [vmem:[%s138_s1 + $0x10] sm:$0xff]  ;;  %v17_v2 = vld [vmem:[%s138_s1 + $0x8] sm:$0xff] }
   0x2   :  { %40 = vmatpush.msra.mxu0 %v19_v0 }
   0x3   :  { %8 = vsyncpa [#allocation3], 0  ;;  %v16_v3 = vld [vmem:[%s138_s1] sm:$0xff]  ;;  %vm24_vm0 = vcmask 261120   ;;  %s95_s24 = smov [#allocation2]   ;;  %s57_s28 = sshll.u32 %s140_s3, 4  ;;  %s58_s28 = int_to_ptr.hbm [resolvable:$true] %s57_s28 }
   0x4   :  { %41 = vmatpush.msra.mxu0 %v18_v1  ;;  %v15_v4 = vld [vmem:[%s137_s0] sm:$0xff]  ;;  %s55_s25 = sshll.u32 %s95_s24, 4  ;;  %vm48_vm1 = vcmask 130048   ;;  %s56_s25 = int_to_ptr.vmem [resolvable:$true] %s55_s25 }
   0x5   :  { %v68_v5 = vld [vmem:[%s139_s2] ss:$0 sm:$0xff] }
   0x6   :  { %42 = vmatpush.msra.mxu0 %v17_v2 }
   0x8   :  { %43 = vmatpush.msra.mxu0 %v16_v3 }
   0x9   :  { %66 = vmatmul.msk.f32.vlgmr.msra.gmra.mxu0 %vm24_vm0, %v15_v4 }
  0x86   :  { %v45_v6 = vpop.f32.mrf.mxu0 }
  0x87   :  { %v46_v7 = vadd.f32 %v68_v5, %v45_v6 }
  0x89   :  { %49 = vst.msk [vmem:[#allocation2] sm:$0xff] %vm48_vm1, %v46_v7 }
  0x8a   :  { %60 = dma.vmem_to_hbm [thread:$0]  %s56_s25, 128, %s58_s28, [#allocation3]  }
  0x8b   :  { %93 = dma.done.wait [#allocation3], 128  }
  0x8c   :  { %94 = vsyncadd [#allocation3], 4294967168 }
  0x8d   :  { %65 = vsyncpa [#allocation3], 1 }

</bundles_post_ra>
